<compile_context>
chip_gen: v7x
topology: tpu7x:2x2x1
jax: 0.10.0
libtpu: 0.0.40
codegen_flags: <defaults>
</compile_context>

<pallas_src>
import jax
import jax.numpy as jnp
from jax import lax
from jax.experimental import pallas as pl
from jax.experimental.pallas import tpu as pltpu


def _round_up(x, m):
    return ((x + m - 1) // m) * m


def _biaffine_kernel(const_ref,                                # SMEM: bias+b_l+b_r, (1,)
                     xl_ref, xr_ref, mat_ref, wl_ref, wr_ref,  # VMEM inputs
                     out_ref,                                  # VMEM output tile
                     t_ref, lin_l_ref):                        # VMEM scratch
    j = pl.program_id(2)

    xl = xl_ref[0]                                  # (TM, D_l)
    xr = xr_ref[0]                                  # (TN, D_r)

    # x_l_tile @ M and linear_l(x_l_tile) depend only on (b, i): compute once
    # at j == 0 and reuse across all column tiles (j axis is sequential).
    @pl.when(j == 0)
    def _():
        t_ref[...] = jnp.dot(
            xl, mat_ref[...], preferred_element_type=jnp.float32
        ).astype(t_ref.dtype)
        # linear_l: VPU mul + lane reduction -> (TM, 1); avoids an N=1 matmul.
        lin_l_ref[...] = jnp.sum(
            xl.astype(jnp.float32) * wl_ref[...], axis=-1, keepdims=True)

    # Bilinear score tile: contract last dims of both operands directly
    # (no explicit transpose of the x_r tile before the MXU).
    score = lax.dot_general(
        t_ref[...], xr,
        dimension_numbers=(((1,), (1,)), ((), ())),
        preferred_element_type=jnp.float32)          # (TM, TN)

    # linear_r in row form: (1, D_r) . (TN, D_r)^T -> (1, TN); no result
    # transpose needed for the broadcast over rows.
    lin_r = lax.dot_general(
        wr_ref[...].astype(xr.dtype), xr,
        dimension_numbers=(((1,), (1,)), ((), ())),
        preferred_element_type=jnp.float32)          # (1, TN)

    # Single fused epilogue: score + column-broadcast + row-broadcast + scalar.
    out_ref[0] = (score + lin_l_ref[...] + lin_r + const_ref[0]).astype(out_ref.dtype)


def biaffine(x_l, x_r, matrix, bias, w_l, b_l, w_r, b_r,
             *, tm=256, tn=256, mxu_dtype=None):
    """Biaffine forward.  Returns (B, S_l, S_r) float32 scores."""
    B, S_l, D_l = x_l.shape
    B2, S_r, D_r = x_r.shape
    assert B == B2 and matrix.shape == (D_l, D_r)
    out_dtype = jnp.float32

    # Optional bf16 MXU operands (f32 accumulation kept inside the kernel).
    if mxu_dtype is not None:
        x_l = x_l.astype(mxu_dtype)
        x_r = x_r.astype(mxu_dtype)
        matrix = matrix.astype(mxu_dtype)

    # Fold the three scalar offsets into one constant -> one broadcast add.
    const = (bias.astype(jnp.float32) + b_l.astype(jnp.float32)
             + b_r.astype(jnp.float32)).reshape(1)
    w_l = w_l.astype(jnp.float32).reshape(1, D_l)
    w_r = w_r.astype(jnp.float32).reshape(1, D_r)

    # Tile sizes: sublane-aligned TM (mult of 8), lane-dense TN (mult of 128).
    # Defaults (256, 256) keep the double-buffered working set comfortably
    # under the scoped-VMEM default even for D ~ 1K, so the same tiling fits
    # v5e/v6e (128 MiB) and v7x (64 MiB).
    tm = _round_up(min(tm, _round_up(S_l, 8)), 8)
    tn = _round_up(min(tn, _round_up(S_r, 128)), 128)

    S_l_pad = _round_up(S_l, tm)
    S_r_pad = _round_up(S_r, tn)
    if S_l_pad != S_l:
        x_l = jnp.pad(x_l, ((0, 0), (0, S_l_pad - S_l), (0, 0)))
    if S_r_pad != S_r:
        x_r = jnp.pad(x_r, ((0, 0), (0, S_r_pad - S_r), (0, 0)))

    grid = (B, S_l_pad // tm, S_r_pad // tn)

    itemsize = jnp.dtype(x_l.dtype).itemsize
    bytes_accessed = (B * S_l_pad * D_l * itemsize
                      + B * S_r_pad * D_r * itemsize
                      + D_l * D_r * itemsize
                      + B * S_l_pad * S_r_pad * 4)
    flops = (2 * B * S_l_pad * D_l * D_r           # x_l @ M
             + 2 * B * S_l_pad * S_r_pad * D_r)    # (x_l @ M) @ x_r^T

    smem_spec = pl.BlockSpec(memory_space=pltpu.MemorySpace.SMEM)

    out = pl.pallas_call(
        _biaffine_kernel,
        out_shape=jax.ShapeDtypeStruct((B, S_l_pad, S_r_pad), out_dtype),
        grid_spec=pltpu.PrefetchScalarGridSpec(
            num_scalar_prefetch=0,
            grid=grid,
            in_specs=[
                smem_spec,                                              # const
                pl.BlockSpec((1, tm, D_l), lambda b, i, j: (b, i, 0)),  # x_l
                pl.BlockSpec((1, tn, D_r), lambda b, i, j: (b, j, 0)),  # x_r
                pl.BlockSpec((D_l, D_r), lambda b, i, j: (0, 0)),       # M
                pl.BlockSpec((1, D_l), lambda b, i, j: (0, 0)),         # W_l
                pl.BlockSpec((1, D_r), lambda b, i, j: (0, 0)),         # W_r
            ],
            out_specs=pl.BlockSpec((1, tm, tn), lambda b, i, j: (b, i, j)),
            scratch_shapes=[
                pltpu.VMEM((tm, D_r), x_l.dtype),    # t = x_l_tile @ M
                pltpu.VMEM((tm, 1), jnp.float32),    # linear_l(x_l_tile)
            ],
        ),
        compiler_params=pltpu.CompilerParams(
            # j (output columns) reuses the x_l@M scratch -> sequential;
            # b and i shard across TensorCores (v7x megacore).
            dimension_semantics=("parallel", "parallel", "arbitrary")),
        cost_estimate=pl.CostEstimate(
            flops=flops, transcendentals=0, bytes_accessed=bytes_accessed),
    )(const, x_l, x_r, matrix, w_l, w_r)

    return out[:, :S_l, :S_r]


def biaffine_ref(x_l, x_r, matrix, bias, w_l, b_l, w_r, b_r):
    x = jnp.matmul(x_l, matrix)
    x = jnp.matmul(x, jnp.swapaxes(x_r, 1, 2)) + bias[0]
    lin_l = jnp.matmul(x_l, w_l.T) + b_l[0]                 # (B, S_l, 1)
    lin_r = jnp.matmul(x_r, w_r.T) + b_r[0]                 # (B, S_r, 1)
    return x + lin_l + jnp.swapaxes(lin_r, 1, 2)


if __name__ == "__main__":
    B, S_l, S_r = 2, 8, 8
    dim_left, dim_right = 32, 32

    key = jax.random.PRNGKey(0)
    k_xl, k_xr, k_m, k_wl, k_wr, k_bl, k_br = jax.random.split(key, 7)

    x_l = jax.random.normal(k_xl, (B, S_l, dim_left), jnp.float32)
    x_r = jax.random.normal(k_xr, (B, S_r, dim_right), jnp.float32)

    # Parameters (shapes per Biaffine.__init__ / reset_parameters).
    limit = (6.0 / (dim_left + dim_right)) ** 0.5
    matrix = jax.random.uniform(k_m, (dim_left, dim_right), jnp.float32,
                                minval=-limit, maxval=limit)
    bias = jnp.zeros((1,), jnp.float32)
    w_l = jax.random.normal(k_wl, (1, dim_left), jnp.float32) * 0.1
    w_r = jax.random.normal(k_wr, (1, dim_right), jnp.float32) * 0.1
    b_l = jax.random.normal(k_bl, (1,), jnp.float32) * 0.1
    b_r = jax.random.normal(k_br, (1,), jnp.float32) * 0.1

    # Small demo shapes (single tile after padding S_r -> 128).
    out = biaffine(x_l, x_r, matrix, bias, w_l, b_l, w_r, b_r)
    out = jax.block_until_ready(out)
    ref = biaffine_ref(x_l, x_r, matrix, bias, w_l, b_l, w_r, b_r)
    assert out.shape == (B, S_l, S_r)
    assert jnp.allclose(out, ref, atol=1e-4, rtol=1e-4)

    # Multi-tile path: exercises padding, i/j tiling and the j==0 scratch
    # reuse (still small: B=2, S_l=136, S_r=200, D=32).
    S_l2, S_r2 = 136, 200
    x_l2 = jax.random.normal(k_xl, (B, S_l2, dim_left), jnp.float32)
    x_r2 = jax.random.normal(k_xr, (B, S_r2, dim_right), jnp.float32)
    ref2 = biaffine_ref(x_l2, x_r2, matrix, bias, w_l, b_l, w_r, b_r)

    out2 = biaffine(x_l2, x_r2, matrix, bias, w_l, b_l, w_r, b_r,
                    tm=128, tn=128)
    out2 = jax.block_until_ready(out2)
    assert out2.shape == (B, S_l2, S_r2)
    assert jnp.allclose(out2, ref2, atol=1e-3, rtol=1e-3)

    # bf16 MXU operands with f32 accumulation (v6e/v7x fast path).
    out_bf = biaffine(x_l2, x_r2, matrix, bias, w_l, b_l, w_r, b_r,
                      tm=128, tn=128, mxu_dtype=jnp.bfloat16)
    out_bf = jax.block_until_ready(out_bf)
    assert jnp.allclose(out_bf, ref2, atol=2e-1, rtol=2e-1)

    print("KERNEL_OK")
</pallas_src>

<mosaic_0001>
module attributes {stable_mosaic.version = 11 : i64} {
  func.func @_biaffine_kernel(%arg0: i32, %arg1: i32, %arg2: i32, %arg3: memref<1xf32, #tpu.memory_space<smem>>, %arg4: memref<1x8x32xf32, #tpu.memory_space<vmem>>, %arg5: memref<1x128x32xf32, #tpu.memory_space<vmem>>, %arg6: memref<32x32xf32, #tpu.memory_space<vmem>>, %arg7: memref<1x32xf32, #tpu.memory_space<vmem>>, %arg8: memref<1x32xf32, #tpu.memory_space<vmem>>, %arg9: memref<1x8x128xf32, #tpu.memory_space<vmem>>, %arg10: memref<8x32xf32, #tpu.memory_space<vmem>>, %arg11: memref<8x1xf32, #tpu.memory_space<vmem>>) attributes {dimension_semantics = [#tpu.dimension_semantics<parallel>, #tpu.dimension_semantics<parallel>, #tpu.dimension_semantics<arbitrary>], iteration_bounds = array<i64: 2, 1, 1>, scalar_prefetch = 0 : i64, scratch_operands = 2 : i64, tpu.core_type = #tpu.core_type<tc>, window_params = [{transform_indices = @transform_0, window_bounds = array<i64: 1>}, {transform_indices = @transform_1, window_bounds = array<i64: 1, 8, 32>}, {transform_indices = @transform_2, window_bounds = array<i64: 1, 128, 32>}, {pipeline_mode = #tpu.pipeline_mode<synchronous>, transform_indices = @transform_3, window_bounds = array<i64: 32, 32>}, {pipeline_mode = #tpu.pipeline_mode<synchronous>, transform_indices = @transform_4, window_bounds = array<i64: 1, 32>}, {pipeline_mode = #tpu.pipeline_mode<synchronous>, transform_indices = @transform_5, window_bounds = array<i64: 1, 32>}, {transform_indices = @transform_6, window_bounds = array<i64: 1, 8, 128>}]} {
    %c0 = arith.constant 0 : index
    %c0_0 = arith.constant 0 : index
    %c0_1 = arith.constant 0 : index
    %0 = vector.load %arg4[%c0, %c0_0, %c0_1] : memref<1x8x32xf32, #tpu.memory_space<vmem>>, vector<1x8x32xf32>
    %1 = vector.shape_cast %0 : vector<1x8x32xf32> to vector<8x32xf32>
    %c0_2 = arith.constant 0 : index
    %c0_3 = arith.constant 0 : index
    %c0_4 = arith.constant 0 : index
    %2 = vector.load %arg5[%c0_2, %c0_3, %c0_4] : memref<1x128x32xf32, #tpu.memory_space<vmem>>, vector<1x128x32xf32>
    %3 = vector.shape_cast %2 : vector<1x128x32xf32> to vector<128x32xf32>
    %c0_i32 = arith.constant 0 : i32
    %4 = arith.cmpi eq, %arg2, %c0_i32 : i32
    %5 = arith.extui %4 : i1 to i32
    %c0_i32_5 = arith.constant 0 : i32
    %6 = arith.cmpi ne, %5, %c0_i32_5 : i32
    scf.if %6 {
      %c0_17 = arith.constant 0 : index
      %c0_18 = arith.constant 0 : index
      %22 = vector.load %arg6[%c0_17, %c0_18] : memref<32x32xf32, #tpu.memory_space<vmem>>, vector<32x32xf32>
      %cst_19 = arith.constant dense<0.000000e+00> : vector<8x32xf32>
      %23 = tpu.matmul %1, %22, %cst_19 {dimension_numbers = #tpu.dot_dimension_numbers<[1], [0], [0], [1], [0, 0, 1, 1], [], []>} : vector<8x32xf32>, vector<32x32xf32>, vector<8x32xf32> -> vector<8x32xf32>
      %c0_20 = arith.constant 0 : index
      %c0_21 = arith.constant 0 : index
      %24 = vector.load %arg10[%c0_20, %c0_21] : memref<8x32xf32, #tpu.memory_space<vmem>>, vector<8x32xf32>
      tpu.vector_store %arg10[%c0_20, %c0_21], %23 {strides = array<i32>} : memref<8x32xf32, #tpu.memory_space<vmem>>, vector<8x32xf32>,
      %c0_22 = arith.constant 0 : index
      %c0_23 = arith.constant 0 : index
      %25 = vector.load %arg7[%c0_22, %c0_23] : memref<1x32xf32, #tpu.memory_space<vmem>>, vector<1x32xf32>
      %26 = vector.broadcast %25 : vector<1x32xf32> to vector<8x32xf32>
      %27 = arith.mulf %1, %26 : vector<8x32xf32>
      %cst_24 = arith.constant dense<0.000000e+00> : vector<8xf32>
      %28 = vector.multi_reduction <add>, %27, %cst_24 [1] : vector<8x32xf32> to vector<8xf32>
      %29 = vector.shape_cast %28 : vector<8xf32> to vector<8x1xf32>
      %c0_25 = arith.constant 0 : index
      %c0_26 = arith.constant 0 : index
      %30 = vector.load %arg11[%c0_25, %c0_26] : memref<8x1xf32, #tpu.memory_space<vmem>>, vector<8x1xf32>
      tpu.vector_store %arg11[%c0_25, %c0_26], %29 {strides = array<i32>} : memref<8x1xf32, #tpu.memory_space<vmem>>, vector<8x1xf32>,
    } else {
    }
    %c0_6 = arith.constant 0 : index
    %c0_7 = arith.constant 0 : index
    %7 = vector.load %arg10[%c0_6, %c0_7] : memref<8x32xf32, #tpu.memory_space<vmem>>, vector<8x32xf32>
    %cst = arith.constant dense<0.000000e+00> : vector<8x128xf32>
    %8 = tpu.matmul %7, %3, %cst {dimension_numbers = #tpu.dot_dimension_numbers<[1], [1], [0], [0], [0, 0, 1, 0], [], []>} : vector<8x32xf32>, vector<128x32xf32>, vector<8x128xf32> -> vector<8x128xf32>
    %c0_8 = arith.constant 0 : index
    %c0_9 = arith.constant 0 : index
    %9 = vector.load %arg8[%c0_8, %c0_9] : memref<1x32xf32, #tpu.memory_space<vmem>>, vector<1x32xf32>
    %cst_10 = arith.constant dense<0.000000e+00> : vector<1x128xf32>
    %10 = tpu.matmul %9, %3, %cst_10 {dimension_numbers = #tpu.dot_dimension_numbers<[1], [1], [0], [0], [0, 0, 1, 0], [], []>} : vector<1x32xf32>, vector<128x32xf32>, vector<1x128xf32> -> vector<1x128xf32>
    %c0_11 = arith.constant 0 : index
    %c0_12 = arith.constant 0 : index
    %11 = vector.load %arg11[%c0_11, %c0_12] : memref<8x1xf32, #tpu.memory_space<vmem>>, vector<8x1xf32>
    %12 = vector.broadcast %11 : vector<8x1xf32> to vector<8x128xf32>
    %13 = arith.addf %8, %12 : vector<8x128xf32>
    %14 = vector.broadcast %10 : vector<1x128xf32> to vector<8x128xf32>
    %15 = arith.addf %13, %14 : vector<8x128xf32>
    %c0_13 = arith.constant 0 : index
    %16 = memref.load %arg3[%c0_13] : memref<1xf32, #tpu.memory_space<smem>>
    %17 = vector.broadcast %16 : f32 to vector<8x128xf32>
    %18 = arith.addf %15, %17 : vector<8x128xf32>
    %c0_14 = arith.constant 0 : index
    %c0_15 = arith.constant 0 : index
    %c0_16 = arith.constant 0 : index
    %19 = vector.load %arg9[%c0_14, %c0_15, %c0_16] : memref<1x8x128xf32, #tpu.memory_space<vmem>>, vector<1x8x128xf32>
    %20 = vector.shape_cast %19 : vector<1x8x128xf32> to vector<8x128xf32>
    %21 = vector.shape_cast %18 : vector<8x128xf32> to vector<1x8x128xf32>
    tpu.vector_store %arg9[%c0_14, %c0_15, %c0_16], %21 {strides = array<i32>} : memref<1x8x128xf32, #tpu.memory_space<vmem>>, vector<1x8x128xf32>,
    return
  }
  func.func @transform_0(%arg0: i32, %arg1: i32, %arg2: i32) -> i32 {
    %c0_i32 = arith.constant 0 : i32
    %c0_i32_0 = arith.constant 0 : i32
    return %c0_i32 : i32
  }
  func.func @transform_1(%arg0: i32, %arg1: i32, %arg2: i32) -> (i32, i32, i32) {
    %c0_i32 = arith.constant 0 : i32
    %c0_i32_0 = arith.constant 0 : i32
    return %arg0, %arg1, %c0_i32 : i32, i32, i32
  }
  func.func @transform_2(%arg0: i32, %arg1: i32, %arg2: i32) -> (i32, i32, i32) {
    %c0_i32 = arith.constant 0 : i32
    %c0_i32_0 = arith.constant 0 : i32
    return %arg0, %arg2, %c0_i32 : i32, i32, i32
  }
  func.func @transform_3(%arg0: i32, %arg1: i32, %arg2: i32) -> (i32, i32) {
    %c0_i32 = arith.constant 0 : i32
    %c0_i32_0 = arith.constant 0 : i32
    %c0_i32_1 = arith.constant 0 : i32
    return %c0_i32, %c0_i32_0 : i32, i32
  }
  func.func @transform_4(%arg0: i32, %arg1: i32, %arg2: i32) -> (i32, i32) {
    %c0_i32 = arith.constant 0 : i32
    %c0_i32_0 = arith.constant 0 : i32
    %c0_i32_1 = arith.constant 0 : i32
    return %c0_i32, %c0_i32_0 : i32, i32
  }
  func.func @transform_5(%arg0: i32, %arg1: i32, %arg2: i32) -> (i32, i32) {
    %c0_i32 = arith.constant 0 : i32
    %c0_i32_0 = arith.constant 0 : i32
    %c0_i32_1 = arith.constant 0 : i32
    return %c0_i32, %c0_i32_0 : i32, i32
  }
  func.func @transform_6(%arg0: i32, %arg1: i32, %arg2: i32) -> (i32, i32, i32) {
    %c0_i32 = arith.constant 0 : i32
    return %arg0, %arg1, %arg2 : i32, i32, i32
  }
}

</mosaic_0001>

<bundles_post_ra>
// kernel: tpu_custom_call.1
= control target key start
LH: loop header
LB: loop body
LE: loop exit
PB: predicated region body
PF: predicated region fallthrough
CT: control target
= control target key end

     0   :  { %s1390_s0 = inlined_call_operand.<no memory space> [shape: f32[1], index: 0, kind: input, shape index: {}]   ;;  %s1391_s1 = inlined_call_operand.vmem [shape: f32[2,8,32], index: 1, kind: input, shape index: {}]   ;;  %s1392_s2 = inlined_call_operand.vmem [shape: f32[2,128,32], index: 2, kind: input, shape index: {}]   ;;  %s1393_s3 = inlined_call_operand.vmem [shape: f32[32,32], index: 3, kind: input, shape index: {}]   ;;  %s1394_s4 = inlined_call_operand.vmem [shape: f32[1,32], index: 4, kind: input, shape index: {}]   ;;  %s1395_s5 = inlined_call_operand.vmem [shape: f32[1,32], index: 5, kind: input, shape index: {}]   ;;  %s1396_s6 = inlined_call_operand.hbm [shape: f32[2,8,128], index: 6, kind: output, shape index: {}]  }
   0x1   :  { %11 = sst [smem:[#allocation4]] %s1390_s0 }
   0x2   :  { %12 = vsyncpa [#allocation6], 0 }
   0x3   :  { %14 = vsyncpa [#allocation6 + $0x1], 0  ;;  %s1175_s23 = smov 0   ;;  %s1177_s24 = smov 0  }
   0x4   :  { %s1179_s25 = smov 0   ;;  %s1181_s26 = smov 0  }
   0x5   :  { %s1183_s27 = smov 0   ;;  %s1185_s28 = smov 0  }
   0x6 LB: > { %s752_s0 = sadd.s32 4294967295, %s1130_s28   ;;  %s753_s29 = sadd.s32 4294967294, %s1130_s28   ;;  %s1130_s28 = sphi %s1185_s28, %s20_s28   ;;  %s1126_s27 = sphi %s1183_s27, %s1405_s27   ;;  %s1122_s26 = sphi %s1181_s26, %s1404_s26   ;;  %s1118_s25 = sphi %s1179_s25, %s1403_s25   ;;  %s1114_s24 = sphi %s1177_s24, %s1402_s24   ;;  %s1110_s23 = sphi %s1175_s23, %s1401_s23  }
   0x7   : > { %s39_s30 = sadd.s32 1, %s1126_s27  ;;  %s190_s7 = sadd.s32 1, %s1118_s25 }
   0x8   : > { %p41_p0 = scmp.ge.s32.totalorder %s39_s30, 2  ;;  %p200_p1 = scmp.ne.s32.totalorder %s1118_s25, %s1114_s24 }
   0x9   : > { %p201_p2 = scmp.eq.s32.totalorder %s752_s0, 1  ;;  %p206_p3 = scmp.ne.s32.totalorder %s1114_s24, %s1110_s23 }
   0xa   : > { %s1407_s30 = smov (%p41_p0, %s39_s30), 0  ;;  %p207_p5 = scmp.eq.s32.totalorder %s753_s29, 1 }
   0xb   : > { %p1215_p4 = por %p201_p2, %p200_p1  ;;  %s183_s9 = ssub.s32 %s1126_s27, %s1407_s30 }
   0xc   : > { %p756_p6 = scmp.ge.s32.totalorder %s1130_s28, 1  ;;  %p188_p7 = scmp.eq.s32.totalorder %s183_s9, 0 }
   0xd   : > { %p1222_p8 = por %p207_p5, %p206_p3  ;;  %p260_p9 = scmp.lt.s32.totalorder %s1130_s28, 3 }
   0xe   : > { %s1228_s11 = scalar_select %p188_p7, %s1118_s25, %s190_s7  }
   0xf   : > { %p261_p10 = pnand %p756_p6, %p260_p9 }
  0x10   : > { %v339_v0 = vld [vmem:[%s1393_s3] sm:$0xff] (!%p261_p10)  ;;  %v340_v1 = vld [vmem:[%s1393_s3 + $0x8] sm:$0xff] (!%p261_p10)  ;;  %v341_v2 = vld [vmem:[%s1393_s3 + $0x10] sm:$0xff] (!%p261_p10)  ;;  %v1132_v3 = vmov (!%p261_p10), 0.0|0.0   ;;  %vm1133_vm0 = vmmov (!%p261_p10), 0   ;;  %v1134_v6 = vmov (!%p261_p10), 0.0   ;;  %v634_v46 = vlaneseq (!%p261_p10) }
  0x11   : > { %264 = sbr.rel (%p261_p10) target bundleno = 481 (0x1e1), region = 44  ;;  %922 = vmatprep.subr.bf16.mxu0 (!%p261_p10), %v1132_v3  ;;  %v923_v4 = vpack.c.bf16 (!%p261_p10), %v340_v1, %v339_v0  ;;  %v342_v5 = vld [vmem:[%s1393_s3 + $0x18] sm:$0xff] (!%p261_p10)  ;;  %849 = vmatprep.mubr.msk.f32.mxu0 (!%p261_p10), %vm1133_vm0, %v1134_v6  ;;  %p301_p11 = scmp.lt.s32.totalorder (!%p261_p10), %s1122_s26, 1  ;;  %vm343_vm1 = vcmask (!%p261_p10), 261120   ;;  %v762_v8 = vld [vmem:[%s1394_s4] ss:$0 sm:$0xff] (!%p261_p10) }
  0x12   : > { %928 = vmatprep.subr.bf16.mxu1 (!%p261_p10), %v1132_v3  ;;  %884 = vmatprep.mubr.msk.f32.mxu1 (!%p261_p10), %vm1133_vm0, %v1134_v6  ;;  %v926_v7 = vpack.c.bf16 (!%p261_p10), %v342_v5, %v341_v2  ;;  %vm1262_vm2 = vmpackc.low (!%p261_p10), %vm343_vm1, %vm343_vm1  ;;  %v432_v37 = vld [vmem:[%s1395_s5] sm:$0x1] (!%p261_p10)  ;;  %v1135_v38 = vmov (!%p261_p10), 0   ;;  %vm429_vm3 = vcmask (!%p261_p10), 7168   ;;  %v635_v47 = vshrl.u32 (!%p261_p10), %v634_v46, 7  ;;  %s298_s18 = sand.u32 (!%p261_p10), 1, %s1114_s24  }
  0x13   : > { %924 = vmatpush3.bf16.msra.mxu0 (!%p261_p10), %v923_v4  ;;  %1051 = vset.pattern.permute.xlu0 (!%p261_p10), %v1135_v38  ;;  %s639_s19 = sld [smem:[#allocation4]] (!%p261_p10) }
  0x14   : > { %925 = vmatprep.subr.bf16.mxu0 (!%p261_p10), %v1132_v3  ;;  %v636_v48 = vsub.s32 (!%p261_p10), 0, %v635_v47 }
  0x17   : > { %927 = vmatpush3.bf16.msra.mxu0 (!%p261_p10), %v926_v7 }
  0x18   : > { %s302_s20 = scalar_select %p301_p11, %s1122_s26, 1  ;;  %960 = vmatprep.subr.bf16.mxu0 %v1132_v3 }
  0x19   : > { %v640_v54 = vstv %s639_s19 }
  0x1a   : > { %s758_s21 = sshll.u32 %s302_s20, 3  ;;  %s801_s22 = sshll.u32 %s302_s20, 7 }
  0x1b   : > { %s307_s12 = scalar_lea.vmem %s1391_s1, %s758_s21  ;;  %s1258_s15 = scalar_lea.vmem %s1392_s2, %s801_s22 }
  0x1c   : > { %v318_v10 = vld [vmem:[%s307_s12] sm:$0xff]  ;;  %v320_v12 = vld [vmem:[%s1258_s15 + $0x8] sm:$0xff]  ;;  %v321_v16 = vld [vmem:[%s1258_s15 + $0x10] sm:$0xff]  ;;  %s757_s20 = sshll.u32 %s298_s18, 3  ;;  %s798_s21 = sshll.u32 %s1122_s26, 7 }
  0x1d   : > { %v319_v11 = vld [vmem:[%s1258_s15] sm:$0xff]  ;;  %v425_v13 = vmul.f32 %v762_v8, %v318_v10  ;;  %850 = vmatmul.mubr.msk.f32.vlgmr.msra.gmra.mrb[0].mxu0 %vm343_vm1, %v318_v10  ;;  %v322_v17 = vld [vmem:[%s1258_s15 + $0x18] sm:$0xff]  ;;  %v324_v20 = vld [vmem:[%s1258_s15 + $0x28] sm:$0xff]  ;;  %s300_s22 = scalar_lea.vmem [#allocation5], %s757_s20  ;;  %s1343_s9 = scalar_lea.hbm %s1396_s6, %s798_s21 }
  0x1e   : > { %v929_v14 = vpack.c.bf16 %v320_v12, %v319_v11  ;;  %919 = vmatprep.mubr.msk.f32.mxu0 %vm1133_vm0, %v1134_v6  ;;  %v933_v18 = vpack.c.bf16 %v322_v17, %v321_v16  ;;  %v323_v19 = vld [vmem:[%s1258_s15 + $0x20] sm:$0xff]  ;;  %v325_v22 = vld [vmem:[%s1258_s15 + $0x30] sm:$0xff]  ;;  %v326_v23 = vld [vmem:[%s1258_s15 + $0x38] sm:$0xff]  ;;  %s659_s0 = sshll.u32 %s300_s22, 4  ;;  %s644_s12 = scalar_lea.sflag [#allocation6], %s298_s18  ;;  %s1345_s0 = int_to_ptr.vmem [resolvable:$true] %s659_s0 }
  0x1f   : > { %v426_v15 = vsel %vm343_vm1, %v425_v13, 0.0  ;;  %v937_v21 = vpack.c.bf16 %v324_v20, %v323_v19  ;;  %v941_v24 = vpack.c.bf16 %v326_v23, %v325_v22  ;;  %v327_v25 = vld [vmem:[%s1258_s15 + $0x40] sm:$0xff]  ;;  %v328_v26 = vld [vmem:[%s1258_s15 + $0x48] sm:$0xff]  ;;  %v329_v28 = vld [vmem:[%s1258_s15 + $0x50] sm:$0xff]  ;;  %s1052_s13 = scalar_lea.vmem %s1345_s0, 128  ;;  %s1136_s26 = smov [#allocation5]  }
  0x20   : > { %931 = vmatpush3.bf16.xpose.msk.msra.mxu1 %vm1262_vm2, %v929_v14  ;;  %427 = vadd.xlane.f32.xlu0 %v426_v15  ;;  %v945_v27 = vpack.c.bf16 %v328_v26, %v327_v25  ;;  %v330_v29 = vld [vmem:[%s1258_s15 + $0x58] sm:$0xff]  ;;  %v331_v31 = vld [vmem:[%s1258_s15 + $0x60] sm:$0xff]  ;;  %v332_v32 = vld [vmem:[%s1258_s15 + $0x68] sm:$0xff]  ;;  %p1053_p12 = scmp.ne.s32.totalorder %s1345_s0, %s1052_s13  ;;  %s1056_s14 = sshll.u32 %s1136_s26, 4  ;;  %s1057_s14 = int_to_ptr.vmem [resolvable:$false] %s1056_s14 }
  0x21   : > { %932 = vmatprep.subr.bf16.mxu1 %v1132_v3  ;;  %963 = vmatpush3.bf16.xpose.msk.msra.mxu0 %vm1262_vm2, %v929_v14  ;;  %v949_v30 = vpack.c.bf16 %v330_v29, %v329_v28  ;;  %v953_v33 = vpack.c.bf16 %v332_v32, %v331_v31  ;;  %v333_v34 = vld [vmem:[%s1258_s15 + $0x70] sm:$0xff]  ;;  %v334_v35 = vld [vmem:[%s1258_s15 + $0x78] sm:$0xff]  ;;  %s1058_s15 = scalar_lea.vmem %s1057_s14, 256  ;;  %p1059_p1 = scmp.lt.s32.totalorder %s1345_s0, %s1057_s14 }
  0x22   : > { %964 = vmatprep.subr.bf16.mxu0 %v1132_v3  ;;  %v957_v36 = vpack.c.bf16 %v334_v35, %v333_v34  ;;  %p1054_p13 = pnand %p1053_p12, %p1215_p4  ;;  %p1060_p2 = scmp.lt.s32.totalorder %s1058_s15, %s1052_s13 }
  0x24   : > { %p1055_p0 = pneg %p1054_p13  ;;  %p1061_p3 = por %p1060_p2, %p1059_p1 }
  0x26   : > { %p1062_p5 = pnand %p1061_p3, %p1055_p0 }
  0x28   : > { %935 = vmatpush3.bf16.xpose.msk.msra.mxu1 %vm1262_vm2, %v933_v18 }
  0x29   : > { %936 = vmatprep.subr.bf16.mxu1 %v1132_v3  ;;  %967 = vmatpush3.bf16.xpose.msk.msra.mxu0 %vm1262_vm2, %v933_v18 }
  0x2a   : > { %968 = vmatprep.subr.bf16.mxu0 %v1132_v3 }
  0x30   : > { %939 = vmatpush3.bf16.xpose.msk.msra.mxu1 %vm1262_vm2, %v937_v21 }
  0x31   : > { %940 = vmatprep.subr.bf16.mxu1 %v1132_v3  ;;  %971 = vmatpush3.bf16.xpose.msk.msra.mxu0 %vm1262_vm2, %v937_v21 }
  0x32   : > { %972 = vmatprep.subr.bf16.mxu0 %v1132_v3 }
  0x38   : > { %943 = vmatpush3.bf16.xpose.msk.msra.mxu1 %vm1262_vm2, %v941_v24 }
  0x39   : > { %944 = vmatprep.subr.bf16.mxu1 %v1132_v3  ;;  %975 = vmatpush3.bf16.xpose.msk.msra.mxu0 %vm1262_vm2, %v941_v24 }
  0x3a   : > { %976 = vmatprep.subr.bf16.mxu0 %v1132_v3 }
  0x40   : > { %947 = vmatpush3.bf16.xpose.msk.msra.mxu1 %vm1262_vm2, %v945_v27 }
  0x41   : > { %948 = vmatprep.subr.bf16.mxu1 %v1132_v3  ;;  %979 = vmatpush3.bf16.xpose.msk.msra.mxu0 %vm1262_vm2, %v945_v27 }
  0x42   : > { %980 = vmatprep.subr.bf16.mxu0 %v1132_v3 }
  0x48   : > { %951 = vmatpush3.bf16.xpose.msk.msra.mxu1 %vm1262_vm2, %v949_v30 }
  0x49   : > { %952 = vmatprep.subr.bf16.mxu1 %v1132_v3  ;;  %983 = vmatpush3.bf16.xpose.msk.msra.mxu0 %vm1262_vm2, %v949_v30 }
  0x4a   : > { %984 = vmatprep.subr.bf16.mxu0 %v1132_v3 }
  0x50   : > { %955 = vmatpush3.bf16.xpose.msk.msra.mxu1 %vm1262_vm2, %v953_v33 }
  0x51   : > { %956 = vmatprep.subr.bf16.mxu1 %v1132_v3  ;;  %987 = vmatpush3.bf16.xpose.msk.msra.mxu0 %vm1262_vm2, %v953_v33 }
  0x52   : > { %988 = vmatprep.subr.bf16.mxu0 %v1132_v3 }
  0x58   : > { %959 = vmatpush3.bf16.xpose.msk.msra.mxu1 %vm1262_vm2, %v957_v36 }
  0x59   : > { %991 = vmatpush3.bf16.xpose.msk.msra.mxu0 %vm1262_vm2, %v957_v36 }
  0x5f   : > { %885 = vmatmul.mubr.msk.f32.vlgmr.msra.gmra.mrb[0].mxu1 %vm343_vm1, %v432_v37 }
  0xad   : > { %v428_v39 = vpop.xlane.xlu0 %427 }
  0xae   : > { %430 = vst.msk [vmem:[#allocation3] sm:$0xff] %vm429_vm3, %v428_v39 }
  0xb5   : > { %v555_v40 = vld [vmem:[#allocation3] sm:$0xff] }
  0xb6   : > { %558 = vperm.xlu0 %1051, %v555_v40  }
  0xf0   : > { %v413_v41 = vpop.f32.mrb[0].mxu0 }
  0xf1   : > { %417 = vst.msk [vmem:[#allocation2] sm:$0xff] %vm343_vm1, %v413_v41  ;;  %v851_v42 = vpop.f32.mrb[1].mxu0 }
  0xf8   : > { %v431_v43 = vld [vmem:[#allocation2] sm:$0xff] }
  0xf9   : > { %920 = vmatmul.mubr.msk.f32.vlgmr.msra.gmra.mrb[2].mxu0 %vm343_vm1, %v431_v43 }
 0x132   : > { %v551_v44 = vpop.f32.mrb[0].mxu1 }
 0x133   : > { %v886_v45 = vpop.f32.mrb[1].mxu1  ;;  %v637_v50 = vrot.slane %v551_v44, %v636_v48 }
 0x135   : > { %v559_v49 = vpop.permute.xlu0 %558 }
 0x1cc   : > { %v630_v51 = vpop.f32.mrb[2].mxu0 }
 0x1cd   : > { %v631_v52 = vadd.f32 %v630_v51, %v559_v49  ;;  %v921_v53 = vpop.f32.mrb[3].mxu0 }
 0x1cf   : > { %v638_v55 = vadd.f32 %v637_v50, %v631_v52 }
 0x1d1   : > { %v641_v56 = vadd.f32 %v640_v54, %v638_v55 }
 0x1d3   : > { %642 = vst [vmem:[%s300_s22] sm:$0xff] %v641_v56 }
 0x1d4   : > { %1065 = shalt.err (!%p1062_p5)
}
 0x1d5   : > { %s1066_s16 = scalar_lea.hbm %s1343_s9, 128  ;;  %s1070_s19 = scalar_lea.hbm %s1396_s6, 256 }
 0x1d6   : > { %p1067_p6 = scmp.ne.s32.totalorder %s1343_s9, %s1066_s16  ;;  %p1071_p10 = scmp.lt.u32.totalorder %s1343_s9, %s1396_s6 }
 0x1d7   : > { %p1072_p11 = scmp.lt.u32.totalorder %s1070_s19, %s1066_s16  ;;  %p1074_p13 = scmp.lt.u32.totalorder %s1066_s16, %s1343_s9 }
 0x1d8   : > { %p1068_p7 = pnand %p1067_p6, %p1215_p4 }
 0x1d9   : > { %p1073_p12 = por %p1072_p11, %p1071_p10 }
 0x1da   : > { %p1069_p9 = pneg %p1068_p7 }
 0x1db   : > { %p1075_p0 = por %p1074_p13, %p1073_p12 }
 0x1dd   : > { %p1076_p1 = pnand %p1075_p0, %p1069_p9 }
 0x1df   : > { %1079 = shalt.err (!%p1076_p1)
}
 0x1e0   : > { %992 = dma.vmem_to_hbm [thread:$0]  (%p1215_p4), %s1345_s0, 128, %s1343_s9, %s644_s12  }
 0x1e1 PF: > { %p998_p2 = scmp.ge.s32.totalorder %s1130_s28, 2  ;;  %s671_s22 = sand.u32 1, %s1110_s23  }
 0x1e2   : > { %s672_s29 = scalar_lea.sflag [#allocation6], %s671_s22 }
 0x1e3   : > { %p995_p3 = pnand %p998_p2, %p1222_p8 }
 0x1e5   : > { %1105 = dma.done.wait (!%p995_p3), %s672_s29, 128  }
 0x1e6   : > { %1107 = vsyncadd (!%p995_p3), %s672_s29, 4294967168  ;;  %s20_s28 = sadd.s32 1, %s1130_s28   ;;  %s1401_s23 = smov %s1114_s24 }
 0x1e7   : > { %p17_p5 = scmp.ge.s32.totalorder %s20_s28, 4   ;;  %s1402_s24 = smov %s1118_s25 }
 0x1e8   : > { %s1403_s25 = smov %s1228_s11  ;;  %s1404_s26 = smov %s1126_s27 }
 0x1e9   : > { %s1405_s27 = smov %s1407_s30  ;;  %19 = sbr.rel (!%p17_p5) target bundleno = 6 (0x6), region = 86 }
 0x1f0   :  { %677 = vsyncpa [#allocation6], 1 }
 0x1f1   :  { %679 = vsyncpa [#allocation6 + $0x1], 1 }

</bundles_post_ra>
